<compile_context>
chip_gen: v7x
topology: tpu7x:2x2x1
jax: 0.10.0
libtpu: 0.0.40
codegen_flags: <defaults>
</compile_context>

<pallas_src>
import jax
import jax.numpy as jnp
from jax import lax
from jax.experimental import pallas as pl
from jax.experimental.pallas import tpu as pltpu


_NUM_PARTIALS = 2  # partial-sum chains (maps to the 2 TCs on v7x; free elsewhere)


def _round_up(x, m):
    return (x + m - 1) // m * m


def _pick_tile_rows(n_rows, n_cols, dtype_bytes):
    """Largest multiple-of-8 row tile targeting ~2 MiB per input tile."""
    target_bytes = 2 * 1024 * 1024
    rows = target_bytes // max(1, n_cols * dtype_bytes)
    rows = max(8, (int(rows) // 8) * 8)
    rows = min(rows, 4096)                       # keep 2 inputs x 2 buffers small
    rows = min(rows, _round_up(max(n_rows, 1), 8))  # never bigger than the problem
    return max(8, rows)


def _make_bce_kernel(n_valid_rows, tiles_per_core):
    """Bake static row count / tiles-per-core into the kernel body."""

    def kernel(prob_ref, tar_ref, out_ref):
        core = pl.program_id(0)   # "parallel" partial-sum axis
        step = pl.program_id(1)   # "arbitrary" accumulation axis (innermost)

        @pl.when(step == 0)
        def _init():
            out_ref[...] = jnp.zeros_like(out_ref)

        p = prob_ref[...].astype(jnp.float32)
        t = tar_ref[...].astype(jnp.float32)
        tile_rows, n_cols = p.shape

        # Mask rows that are padding (beyond the true row count).
        row0 = (core * tiles_per_core + step) * tile_rows
        row = row0 + lax.broadcasted_iota(jnp.int32, (tile_rows, n_cols), 0)
        valid = row < n_valid_rows

        # BCE with PyTorch-style log clamping at -100.
        log_p = jnp.maximum(jnp.log(p), -100.0)
        log_1mp = jnp.maximum(jnp.log(1.0 - p), -100.0)
        elem = -(t * log_p + (1.0 - t) * log_1mp)
        elem = jnp.where(valid, elem, 0.0)

        # Accumulate the tile sum into this core's resident output block.
        out_ref[...] += jnp.sum(elem)

    return kernel


def bce_loss(frame_prob, tar):
    """Pallas equivalent of BCELoss().forward(frame_prob, tar). Returns a scalar."""
    assert frame_prob.shape == tar.shape
    total_elems = frame_prob.size

    # Flatten to 2-D with the last (feature) axis on lanes.
    if frame_prob.ndim <= 1:
        p2 = frame_prob.reshape(1, -1)
        t2 = tar.reshape(1, -1)
    else:
        p2 = frame_prob.reshape(-1, frame_prob.shape[-1])
        t2 = tar.reshape(-1, tar.shape[-1])
    n_rows, n_cols = p2.shape

    dtype_bytes = jnp.dtype(p2.dtype).itemsize
    tile_rows = _pick_tile_rows(n_rows, n_cols, dtype_bytes)

    # Pad rows so the grid is regular; padded rows are masked out in-kernel.
    padded_rows = _round_up(n_rows, _NUM_PARTIALS * tile_rows)
    if padded_rows != n_rows:
        pad = padded_rows - n_rows
        # 0.5 keeps log() finite in the padded region (values are masked anyway).
        p2 = jnp.pad(p2, ((0, pad), (0, 0)), constant_values=0.5)
        t2 = jnp.pad(t2, ((0, pad), (0, 0)), constant_values=0.5)
    tiles_per_core = padded_rows // (_NUM_PARTIALS * tile_rows)

    kernel = _make_bce_kernel(n_rows, tiles_per_core)

    in_map = lambda c, i: (c * tiles_per_core + i, 0)
    partials = pl.pallas_call(
        kernel,
        # One (8,128) partial-sum block per core; element [0,0] of each block
        # carries that core's sum (all elements are equal).
        out_shape=jax.ShapeDtypeStruct((_NUM_PARTIALS * 8, 128), jnp.float32),
        grid_spec=pltpu.PrefetchScalarGridSpec(
            num_scalar_prefetch=0,
            grid=(_NUM_PARTIALS, tiles_per_core),
            in_specs=[
                pl.BlockSpec((tile_rows, n_cols), in_map),
                pl.BlockSpec((tile_rows, n_cols), in_map),
            ],
            out_specs=pl.BlockSpec((8, 128), lambda c, i: (c, 0)),
        ),
        compiler_params=pltpu.CompilerParams(
            dimension_semantics=("parallel", "arbitrary"),
        ),
    )(p2, t2)

    total = jnp.sum(partials.reshape(_NUM_PARTIALS, 8, 128)[:, 0, 0])
    return total / jnp.float32(total_elems)


def _bce_loss_ref(frame_prob, tar):
    """Pure-JAX reference (matches torch.nn.functional.binary_cross_entropy)."""
    p = frame_prob.astype(jnp.float32)
    t = tar.astype(jnp.float32)
    log_p = jnp.maximum(jnp.log(p), -100.0)
    log_1mp = jnp.maximum(jnp.log(1.0 - p), -100.0)
    return jnp.mean(-(t * log_p + (1.0 - t) * log_1mp))


if __name__ == "__main__":
    key = jax.random.PRNGKey(0)
    k1, k2 = jax.random.split(key)

    # frame_prob: probabilities in (0,1) (as expected by BCELoss), shape (B, T, C)
    B, T, C = 2, 8, 32
    frame_prob = jax.nn.sigmoid(jax.random.normal(k1, (B, T, C), dtype=jnp.float32))
    tar = jax.random.uniform(k2, (B, T, C), dtype=jnp.float32)

    loss = bce_loss(frame_prob, tar)
    jax.block_until_ready(loss)

    ref = _bce_loss_ref(frame_prob, tar)
    assert jnp.allclose(loss, ref, atol=1e-5, rtol=1e-5), (loss, ref)

    print("KERNEL_OK")
</pallas_src>

<mosaic_0001>
module attributes {stable_mosaic.version = 11 : i64} {
  func.func @kernel(%arg0: i32, %arg1: i32, %arg2: memref<16x32xf32, #tpu.memory_space<vmem>>, %arg3: memref<16x32xf32, #tpu.memory_space<vmem>>, %arg4: memref<8x128xf32, #tpu.memory_space<vmem>>) attributes {dimension_semantics = [#tpu.dimension_semantics<parallel>, #tpu.dimension_semantics<arbitrary>], iteration_bounds = array<i64: 2, 1>, scalar_prefetch = 0 : i64, scratch_operands = 0 : i64, tpu.core_type = #tpu.core_type<tc>, window_params = [{transform_indices = @transform_0, window_bounds = array<i64: 16, 32>}, {transform_indices = @transform_1, window_bounds = array<i64: 16, 32>}, {transform_indices = @transform_2, window_bounds = array<i64: 8, 128>}]} {
    %c0_i32 = arith.constant 0 : i32
    %0 = arith.cmpi eq, %arg1, %c0_i32 : i32
    %1 = arith.extui %0 : i1 to i32
    %c0_i32_0 = arith.constant 0 : i32
    %2 = arith.cmpi ne, %1, %c0_i32_0 : i32
    scf.if %2 {
      %cst_15 = arith.constant 0.000000e+00 : f32
      %38 = vector.broadcast %cst_15 : f32 to vector<8x128xf32>
      %c0_16 = arith.constant 0 : index
      %c0_17 = arith.constant 0 : index
      %39 = vector.load %arg4[%c0_16, %c0_17] : memref<8x128xf32, #tpu.memory_space<vmem>>, vector<8x128xf32>
      tpu.vector_store %arg4[%c0_16, %c0_17], %38 {strides = array<i32>} : memref<8x128xf32, #tpu.memory_space<vmem>>, vector<8x128xf32>,
    } else {
    }
    %c0 = arith.constant 0 : index
    %c0_1 = arith.constant 0 : index
    %3 = vector.load %arg2[%c0, %c0_1] : memref<16x32xf32, #tpu.memory_space<vmem>>, vector<16x32xf32>
    %c0_2 = arith.constant 0 : index
    %c0_3 = arith.constant 0 : index
    %4 = vector.load %arg3[%c0_2, %c0_3] : memref<16x32xf32, #tpu.memory_space<vmem>>, vector<16x32xf32>
    %c1_i32 = arith.constant 1 : i32
    %5 = arith.muli %arg0, %c1_i32 : i32
    %6 = arith.addi %5, %arg1 : i32
    %c16_i32 = arith.constant 16 : i32
    %7 = arith.muli %6, %c16_i32 : i32
    %8 = tpu.iota {dimensions = array<i32: 0>} : vector<16x32xi32>
    %9 = vector.broadcast %7 : i32 to vector<16x32xi32>
    %10 = arith.addi %9, %8 : vector<16x32xi32>
    %c16_i32_4 = arith.constant 16 : i32
    %11 = vector.broadcast %c16_i32_4 : i32 to vector<16x32xi32>
    %12 = arith.cmpi slt, %10, %11 : vector<16x32xi32>
    %13 = math.log %3 : vector<16x32xf32>
    %cst = arith.constant -1.000000e+02 : f32
    %14 = vector.broadcast %cst : f32 to vector<16x32xf32>
    %15 = arith.maximumf %13, %14 : vector<16x32xf32>
    %cst_5 = arith.constant 1.000000e+00 : f32
    %16 = vector.broadcast %cst_5 : f32 to vector<16x32xf32>
    %17 = arith.subf %16, %3 : vector<16x32xf32>
    %18 = math.log %17 : vector<16x32xf32>
    %cst_6 = arith.constant -1.000000e+02 : f32
    %19 = vector.broadcast %cst_6 : f32 to vector<16x32xf32>
    %20 = arith.maximumf %18, %19 : vector<16x32xf32>
    %21 = arith.mulf %4, %15 : vector<16x32xf32>
    %cst_7 = arith.constant 1.000000e+00 : f32
    %22 = vector.broadcast %cst_7 : f32 to vector<16x32xf32>
    %23 = arith.subf %22, %4 : vector<16x32xf32>
    %24 = arith.mulf %23, %20 : vector<16x32xf32>
    %25 = arith.addf %21, %24 : vector<16x32xf32>
    %cst_8 = arith.constant 0.000000e+00 : f32
    %26 = vector.broadcast %cst_8 : f32 to vector<16x32xf32>
    %27 = arith.subf %26, %25 : vector<16x32xf32>
    %cst_9 = arith.constant 0.000000e+00 : f32
    %28 = vector.broadcast %cst_9 : f32 to vector<16x32xf32>
    %29 = arith.select %12, %27, %28 : vector<16x32xi1>, vector<16x32xf32>
    %c0_10 = arith.constant 0 : index
    %c0_11 = arith.constant 0 : index
    %30 = vector.load %arg4[%c0_10, %c0_11] : memref<8x128xf32, #tpu.memory_space<vmem>>, vector<8x128xf32>
    %31 = vector.shape_cast %29 : vector<16x32xf32> to vector<1x16x32xf32>
    %cst_12 = arith.constant dense<0.000000e+00> : vector<1xf32>
    %32 = vector.multi_reduction <add>, %31, %cst_12 [1, 2] : vector<1x16x32xf32> to vector<1xf32>
    %33 = vector.shape_cast %32 : vector<1xf32> to vector<1x1x1xf32>
    %34 = vector.extract %33[0, 0, 0] : f32 from vector<1x1x1xf32>
    %35 = vector.broadcast %34 : f32 to vector<8x128xf32>
    %36 = arith.addf %30, %35 : vector<8x128xf32>
    %c0_13 = arith.constant 0 : index
    %c0_14 = arith.constant 0 : index
    %37 = vector.load %arg4[%c0_13, %c0_14] : memref<8x128xf32, #tpu.memory_space<vmem>>, vector<8x128xf32>
    tpu.vector_store %arg4[%c0_13, %c0_14], %36 {strides = array<i32>} : memref<8x128xf32, #tpu.memory_space<vmem>>, vector<8x128xf32>,
    return
  }
  func.func @transform_0(%arg0: i32, %arg1: i32) -> (i32, i32) {
    %c1_i32 = arith.constant 1 : i32
    %0 = arith.muli %arg0, %c1_i32 : i32
    %1 = arith.addi %0, %arg1 : i32
    %c0_i32 = arith.constant 0 : i32
    %c0_i32_0 = arith.constant 0 : i32
    return %1, %c0_i32 : i32, i32
  }
  func.func @transform_1(%arg0: i32, %arg1: i32) -> (i32, i32) {
    %c1_i32 = arith.constant 1 : i32
    %0 = arith.muli %arg0, %c1_i32 : i32
    %1 = arith.addi %0, %arg1 : i32
    %c0_i32 = arith.constant 0 : i32
    %c0_i32_0 = arith.constant 0 : i32
    return %1, %c0_i32 : i32, i32
  }
  func.func @transform_2(%arg0: i32, %arg1: i32) -> (i32, i32) {
    %c0_i32 = arith.constant 0 : i32
    %c0_i32_0 = arith.constant 0 : i32
    return %arg0, %c0_i32 : i32, i32
  }
}

</mosaic_0001>

<bundles_post_ra>
// kernel: tpu_custom_call.1
= control target key start
LH: loop header
LB: loop body
LE: loop exit
PB: predicated region body
PF: predicated region fallthrough
CT: control target
= control target key end

     0   :  { %7 = vsyncpa [#allocation3], 0  ;;  %s908_s0 = inlined_call_operand.hbm [shape: f32[32,32], index: 0, kind: input, shape index: {}]   ;;  %s909_s1 = inlined_call_operand.hbm [shape: f32[32,32], index: 1, kind: input, shape index: {}]   ;;  %s910_s2 = inlined_call_operand.hbm [shape: f32[16,128], index: 2, kind: output, shape index: {}]  }
   0x1   :  { %9 = vsyncpa [#allocation3 + $0x1], 0 }
   0x2   :  { %10 = vsyncpa [#allocation6], 0 }
   0x3   :  { %12 = vsyncpa [#allocation6 + $0x1], 0 }
   0x4   :  { %13 = vsyncpa [#allocation4], 0 }
   0x5   :  { %15 = vsyncpa [#allocation4 + $0x1], 0  ;;  %s672_s9 = smov 0   ;;  %s674_s10 = smov 0  }
   0x6   :  { %s676_s11 = smov 0   ;;  %s678_s12 = smov 0  }
   0x7   :  { %s680_s13 = smov 0   ;;  %s682_s14 = smov 0  }
   0x8 LB: > { %s403_s15 = sadd.s32 4294967295, %s650_s14   ;;  %s404_s16 = sadd.s32 4294967294, %s650_s14   ;;  %s650_s14 = sphi %s682_s14, %s21_s14   ;;  %s646_s13 = sphi %s680_s13, %s928_s13   ;;  %s642_s12 = sphi %s678_s12, %s927_s12   ;;  %s638_s11 = sphi %s676_s11, %s926_s11   ;;  %s634_s10 = sphi %s674_s10, %s925_s10   ;;  %s630_s9 = sphi %s672_s9, %s924_s9  }
   0x9   : > { %s33_s17 = sadd.s32 1, %s646_s13  ;;  %s42_s18 = sadd.s32 1, %s638_s11 }
   0xa   : > { %p35_p0 = scmp.ge.s32.totalorder %s33_s17, 2  ;;  %p49_p1 = scmp.ne.s32.totalorder %s638_s11, %s634_s10 }
   0xb   : > { %p50_p2 = scmp.eq.s32.totalorder %s650_s14, 0  ;;  %p55_p3 = scmp.ne.s32.totalorder %s634_s10, %s630_s9 }
   0xc   : > { %s930_s17 = smov (%p35_p0, %s33_s17), 0  ;;  %p56_p5 = scmp.eq.s32.totalorder %s403_s15, 0 }
   0xd   : > { %p713_p4 = por %p50_p2, %p49_p1  ;;  %s39_s20 = ssub.s32 %s646_s13, %s930_s17 }
   0xe   : > { %p107_p6 = scmp.eq.s32.totalorder %s403_s15, 1  ;;  %p40_p7 = scmp.eq.s32.totalorder %s39_s20, 0 }
   0xf   : > { %p719_p8 = por %p56_p5, %p55_p3  ;;  %p113_p10 = scmp.eq.s32.totalorder %s404_s16, 1 }
  0x10   : > { %p723_p9 = por %p107_p6, %p49_p1  ;;  %p443_p13 = scmp.lt.s32.totalorder %s650_s14, 2 }
  0x11   : > { %s914_s21 = scalar_select %p719_p8, 1, 0 }
  0x12   : > { %s915_s22 = scalar_select %p723_p9, 1, 0 }
  0x13   : > { %s728_s23 = scalar_select %p40_p7, %s638_s11, %s42_s18  }
  0x14   : > { %p730_p11 = por %p113_p10, %p55_p3  ;;  %s737_s25 = sand.u32 1, %s638_s11  }
  0x15   : > { %s407_s26 = sshll.u32 %s737_s25, 4  ;;  %s422_s27 = sshll.u32 %s646_s13, 8 }
  0x16   : > { %s916_s24 = scalar_select %p730_p11, 1, 0 }
  0x17   : > { %s746_s30 = scalar_lea.hbm %s908_s0, %s422_s27  ;;  %s137_s3 = scalar_lea.vmem [#allocation2], %s407_s26 }
  0x18   : > { %s145_s4 = sshll.u32 %s137_s3, 4  ;;  %p754_p0 = pnand %p443_p13, %p713_p4  ;;  %s750_s4 = int_to_ptr.vmem [resolvable:$true] %s145_s4 }
  0x19   : > { %s134_s6 = scalar_lea.sflag [#allocation3], %s737_s25  ;;  %s504_s7 = scalar_lea.hbm %s746_s30, 256 }
  0x1a   : > { %p505_p2 = scmp.ne.s32.totalorder %s746_s30, %s504_s7  ;;  %p506_p3 = pneg %p754_p0 }
  0x1b   : > { %s509_s16 = scalar_lea.hbm %s908_s0, 512  ;;  %p510_p4 = scmp.lt.u32.totalorder %s746_s30, %s908_s0 }
  0x1c   : > { %p507_p5 = pnand %p506_p3, %p505_p2  ;;  %p511_p7 = scmp.lt.u32.totalorder %s509_s16, %s504_s7 }
  0x1d   : > { %p513_p13 = scmp.lt.u32.totalorder %s504_s7, %s746_s30 }
  0x1e   : > { %p508_p6 = pneg %p507_p5  ;;  %p512_p10 = por %p511_p7, %p510_p4 }
  0x20   : > { %p514_p12 = por %p513_p13, %p512_p10 }
  0x22   : > { %p515_p1 = pnand %p514_p12, %p508_p6 }
  0x24   : > { %518 = shalt.err (!%p515_p1)
}
  0x25   : > { %s519_s20 = scalar_lea.vmem %s750_s4, 256  ;;  %s652_s28 = smov [#allocation2]  }
  0x26   : > { %p520_p2 = scmp.ne.s32.totalorder %s750_s4, %s519_s20  ;;  %s524_s29 = sshll.u32 %s652_s28, 4  ;;  %s525_s29 = int_to_ptr.vmem [resolvable:$false] %s524_s29 }
  0x27   : > { %s526_s3 = scalar_lea.vmem %s525_s29, 512  ;;  %p527_p9 = scmp.lt.s32.totalorder %s750_s4, %s525_s29 }
  0x28   : > { %p522_p5 = pnand %p520_p2, %p506_p3  ;;  %p528_p4 = scmp.lt.s32.totalorder %s526_s3, %s519_s20 }
  0x2a   : > { %p523_p11 = pneg %p522_p5  ;;  %p529_p7 = por %p528_p4, %p527_p9 }
  0x2c   : > { %p530_p10 = pnand %p529_p7, %p523_p11 }
  0x2e   : > { %533 = shalt.err (!%p530_p10)
}
  0x2f   : > { %s653_s7 = smov 128   ;;  %s654_s8 = smov 8  }
  0x30   : > { %435 = dma.hbm_to_vmem [thread:$0]  (!%p754_p0), %s746_s30, 256, %s750_s4, %s134_s6, %s653_s7, %s653_s7, %s654_s8  }
  0x31   : > { %p175_p9 = scmp.lt.s32.totalorder %s650_s14, 3  ;;  %s796_s18 = scalar_lea.hbm %s909_s1, %s422_s27 }
  0x32   : > { %p918_p11 = scmp.ge.s32.totalorder %s650_s14, 1  ;;  %s159_s20 = scalar_lea.vmem [#allocation5], %s407_s26 }
  0x33   : > { %s167_s28 = sshll.u32 %s159_s20, 4  ;;  %s156_s30 = scalar_lea.sflag [#allocation6], %s737_s25  ;;  %s806_s28 = int_to_ptr.vmem [resolvable:$true] %s167_s28 }
  0x34   : > { %p800_p12 = pnand %p918_p11, %p175_p9  ;;  %s534_s4 = scalar_lea.hbm %s796_s18, 256 }
  0x35   : > { %p535_p1 = scmp.ne.s32.totalorder %s796_s18, %s534_s4  ;;  %s539_s29 = scalar_lea.hbm %s909_s1, 512 }
  0x36   : > { %p540_p2 = scmp.lt.u32.totalorder %s796_s18, %s909_s1  ;;  %p541_p5 = scmp.lt.u32.totalorder %s539_s29, %s534_s4 }
  0x37   : > { %p537_p6 = pnand %p535_p1, %p506_p3  ;;  %p543_p7 = scmp.lt.u32.totalorder %s534_s4, %s796_s18 }
  0x38   : > { %p542_p4 = por %p541_p5, %p540_p2 }
  0x39   : > { %p538_p13 = pneg %p537_p6 }
  0x3a   : > { %p544_p10 = por %p543_p7, %p542_p4 }
  0x3c   : > { %p545_p9 = pnand %p544_p10, %p538_p13 }
  0x3e   : > { %548 = shalt.err (!%p545_p9)
}
  0x3f   : > { %s549_s26 = scalar_lea.vmem %s806_s28, 256  ;;  %s655_s16 = smov [#allocation5]  }
  0x40   : > { %p550_p11 = scmp.ne.s32.totalorder %s806_s28, %s549_s26  ;;  %s554_s20 = sshll.u32 %s655_s16, 4  ;;  %s555_s20 = int_to_ptr.vmem [resolvable:$false] %s554_s20 }
  0x41   : > { %s556_s27 = scalar_lea.vmem %s555_s20, 512  ;;  %p557_p8 = scmp.lt.s32.totalorder %s806_s28, %s555_s20 }
  0x42   : > { %p552_p1 = pnand %p550_p11, %p506_p3  ;;  %p558_p2 = scmp.lt.s32.totalorder %s556_s27, %s549_s26 }
  0x44   : > { %p553_p6 = pneg %p552_p1  ;;  %p559_p5 = por %p558_p2, %p557_p8 }
  0x46   : > { %p560_p4 = pnand %p559_p5, %p553_p6 }
  0x48   : > { %563 = shalt.err (!%p560_p4)
}
  0x49   : > { %438 = dma.hbm_to_vmem [thread:$0]  (!%p754_p0), %s796_s18, 256, %s806_s28, %s156_s30, %s653_s7, %s653_s7, %s654_s8  }
  0x4a   : > { %179 = sbr.rel (%p800_p12) target bundleno = 332 (0x14c), region = 28  ;;  %s840_s4 = sand.u32 (!%p800_p12), 1, %s634_s10  }
  0x4b   : > { %s414_s6 = sshll.u32 (!%p800_p12), %s840_s4, 4  ;;  %s182_s29 = scalar_lea.sflag (!%p800_p12), [#allocation3], %s840_s4 }
  0x4c   : > { %s185_s5 = scalar_lea.vmem (!%p800_p12), [#allocation2], %s414_s6  ;;  %p920_p8 = scmp.ne.s32.totalorder (!%p800_p12), %s914_s21, 0 }
  0x51   : > { %617 = dma.done.wait (%p920_p8), %s182_s29, 256  }
  0x52   : > { %619 = vsyncadd (%p920_p8), %s182_s29, 4294967040  ;;  %s191_s25 = scalar_lea.sflag [#allocation6], %s840_s4  ;;  %s194_s7 = scalar_lea.vmem [#allocation5], %s414_s6 }
  0x53   : > { %621 = dma.done.wait (%p920_p8), %s191_s25, 256  }
  0x54   : > { %623 = vsyncadd (%p920_p8), %s191_s25, 4294967040  ;;  %v229_v0 = vld [vmem:[%s185_s5] sm:$0xff]  ;;  %v230_v1 = vld [vmem:[%s185_s5 + $0x8] sm:$0xff]  ;;  %v235_v4 = vlaneseq  ;;  %s417_s8 = sshll.u32 %s642_s12, 4  ;;  %vm270_vm2 = vcmask 261120   ;;  %s416_s21 = sshll.u32 %s840_s4, 3 }
  0x55   : > { %496 = vlog2.f32 %v229_v0  ;;  %v249_v2 = vsub.f32 1.0, %v229_v0  ;;  %v250_v3 = vsub.f32 1.0, %v230_v1  ;;  %v231_v7 = vld [vmem:[%s194_s7] sm:$0xff]  ;;  %v232_v9 = vld [vmem:[%s194_s7 + $0x8] sm:$0xff]  ;;  %v238_v12 = vstv %s417_s8  ;;  %s419_s18 = sshll.u32 %s642_s12, 7  ;;  %s219_s19 = scalar_lea.vmem [#allocation7], %s416_s21 }
  0x56   : > { %498 = vlog2.f32 %v230_v1  ;;  %v236_v5 = vshrl.u32 %v235_v4, 7  ;;  %v259_v18 = vsub.f32 1.0, %v231_v7  ;;  %v260_v21 = vsub.f32 1.0, %v232_v9  ;;  %s300_s28 = sshll.u32 %s219_s19, 4  ;;  %s859_s26 = scalar_lea.hbm %s910_s2, %s419_s18  ;;  %s861_s28 = int_to_ptr.vmem [resolvable:$true] %s300_s28 }
  0x57   : > { %500 = vlog2.f32 %v249_v2  ;;  %s287_s16 = scalar_lea.sflag [#allocation4], %s840_s4  ;;  %s564_s20 = scalar_lea.vmem %s861_s28, 128 }
  0x58   : > { %502 = vlog2.f32 %v250_v3  ;;  %v237_v15 = vadd.s32 8, %v236_v5  ;;  %v239_v24 = vadd.s32 %v238_v12, %v236_v5  ;;  %p565_p0 = scmp.ne.s32.totalorder %s861_s28, %s564_s20  ;;  %p921_p3 = scmp.ne.s32.totalorder %s915_s22, 0 }
  0x59   : > { %s656_s12 = smov [#allocation7]  }
  0x5a   : > { %v240_v27 = vadd.s32 %v238_v12, %v237_v15  ;;  %vm241_vm0 = vcmp.lt.s32.totalorder %v239_v24, 16  ;;  %p566_p12 = pnand %p565_p0, %p921_p3  ;;  %s568_s27 = sshll.u32 %s656_s12, 4  ;;  %s569_s27 = int_to_ptr.vmem [resolvable:$false] %s568_s27 }
  0x5b   : > { %s570_s6 = scalar_lea.vmem %s569_s27, 256  ;;  %p571_p7 = scmp.lt.s32.totalorder %s861_s28, %s569_s27 }
  0x5c   : > { %vm242_vm1 = vcmp.lt.s32.totalorder %v240_v27, 16  ;;  %p567_p13 = pneg %p566_p12  ;;  %p572_p10 = scmp.lt.s32.totalorder %s570_s6, %s564_s20 }
  0x5e   : > { %p573_p9 = por %p572_p10, %p571_p7 }
  0x5f   : > { %v497_v6 = vpop.eup %496 }
  0x60   : > { %v499_v8 = vpop.eup %498  ;;  %v244_v10 = vmul.f32 0.6931472, %v497_v6  ;;  %p574_p11 = pnand %p573_p9, %p567_p13 }
  0x61   : > { %v501_v11 = vpop.eup %500  ;;  %v246_v13 = vmul.f32 0.6931472, %v499_v8 }
  0x62   : > { %v503_v14 = vpop.eup %502  ;;  %v247_v16 = vmax.f32 %v244_v10, -100.0  ;;  %v252_v17 = vmul.f32 0.6931472, %v501_v11 }
  0x63   : > { %v248_v19 = vmax.f32 %v246_v13, -100.0  ;;  %v254_v20 = vmul.f32 0.6931472, %v503_v14 }
  0x64   : > { %v255_v22 = vmax.f32 %v252_v17, -100.0  ;;  %v257_v23 = vmul.f32 %v247_v16, %v231_v7 }
  0x65   : > { %v256_v25 = vmax.f32 %v254_v20, -100.0  ;;  %v258_v26 = vmul.f32 %v248_v19, %v232_v9 }
  0x66   : > { %v261_v28 = vmul.f32 %v259_v18, %v255_v22 }
  0x67   : > { %v262_v29 = vmul.f32 %v260_v21, %v256_v25 }
  0x68   : > { %v263_v30 = vadd.f32 %v261_v28, %v257_v23 }
  0x69   : > { %v264_v31 = vadd.f32 %v262_v29, %v258_v26 }
  0x6a   : > { %v265_v32 = vsub.f32 0.0, %v263_v30 }
  0x6b   : > { %v266_v33 = vsub.f32 0.0, %v264_v31 }
  0x6c   : > { %v267_v34 = vsel %vm241_vm0, %v265_v32, 0.0 }
  0x6d   : > { %v268_v35 = vsel %vm242_vm1, %v266_v33, 0.0  ;;  %v271_v36 = vsel %vm270_vm2, %v267_v34, 0.0 }
  0x6e   : > { %v272_v37 = vsel %vm270_vm2, %v268_v35, 0.0 }
  0x6f   : > { %v273_v38 = vadd.f32 %v272_v37, %v271_v36 }
  0x71   : > { %274 = vadd.xlane.f32.xlu0 %v273_v38 }
  0xfe   : > { %v275_v39 = vpop.xlane.xlu0 %274 }
  0xff   : > { %v276_v40 = vrot.slane %v275_v39, 4 }
 0x101   : > { %v277_v41 = vadd.f32 %v276_v40, %v275_v39 }
 0x103   : > { %v278_v42 = vrot.slane %v277_v41, 2 }
 0x105   : > { %v279_v43 = vadd.f32 %v278_v42, %v277_v41 }
 0x107   : > { %v280_v44 = vrot.slane %v279_v43, 1 }
 0x109   : > { %v281_v45 = vadd.f32 %v280_v44, %v279_v43 }
 0x10b   : > { %424 = vpush %v281_v45 }
 0x13c   : > { %s425_s30 = spop %424 }
 0x13d   : > { %v283_v46 = vstv %s425_s30 }
 0x13e   : > { %285 = vst [vmem:[%s219_s19] sm:$0xff] %v283_v46 }
 0x13f   : > { %577 = shalt.err (!%p574_p11)
}
 0x140   : > { %s578_s4 = scalar_lea.hbm %s859_s26, 128  ;;  %s582_s25 = scalar_lea.hbm %s910_s2, 256 }
 0x141   : > { %p579_p1 = scmp.ne.s32.totalorder %s859_s26, %s578_s4  ;;  %p583_p5 = scmp.lt.u32.totalorder %s859_s26, %s910_s2 }
 0x142   : > { %p584_p4 = scmp.lt.u32.totalorder %s582_s25, %s578_s4  ;;  %p586_p0 = scmp.lt.u32.totalorder %s578_s4, %s859_s26 }
 0x143   : > { %p580_p6 = pnand %p579_p1, %p921_p3 }
 0x144   : > { %p585_p8 = por %p584_p4, %p583_p5 }
 0x145   : > { %p581_p2 = pneg %p580_p6 }
 0x146   : > { %p587_p12 = por %p586_p0, %p585_p8 }
 0x148   : > { %p588_p13 = pnand %p587_p12, %p581_p2 }
 0x14a   : > { %591 = shalt.err (!%p588_p13)
}
 0x14b   : > { %430 = dma.vmem_to_hbm [thread:$0]  (%p921_p3), %s861_s28, 128, %s859_s26, %s287_s16  }
 0x14c PF: > { %s312_s21 = sand.u32 1, %s630_s9   ;;  %p922_p7 = scmp.ne.s32.totalorder %s916_s24, 0 }
 0x14d   : > { %p923_p10 = scmp.ge.s32.totalorder %s650_s14, 2  ;;  %s313_s18 = scalar_lea.sflag [#allocation4], %s312_s21 }
 0x14f   : > { %p440_p9 = pnand %p923_p10, %p922_p7 }
 0x151   : > { %625 = dma.done.wait (!%p440_p9), %s313_s18, 128  }
 0x152   : > { %627 = vsyncadd (!%p440_p9), %s313_s18, 4294967168  ;;  %s21_s14 = sadd.s32 1, %s650_s14   ;;  %s924_s9 = smov %s634_s10 }
 0x153   : > { %p18_p11 = scmp.ge.s32.totalorder %s21_s14, 4   ;;  %s925_s10 = smov %s638_s11 }
 0x154   : > { %s926_s11 = smov %s728_s23  ;;  %s927_s12 = smov %s646_s13 }
 0x155   : > { %s928_s13 = smov %s930_s17  ;;  %20 = sbr.rel (!%p18_p11) target bundleno = 8 (0x8), region = 90 }
 0x15c   :  { %318 = vsyncpa [#allocation3], 1 }
 0x15d   :  { %320 = vsyncpa [#allocation3 + $0x1], 1 }
 0x15e   :  { %321 = vsyncpa [#allocation6], 1 }
 0x15f   :  { %323 = vsyncpa [#allocation6 + $0x1], 1 }
 0x160   :  { %324 = vsyncpa [#allocation4], 1 }
 0x161   :  { %326 = vsyncpa [#allocation4 + $0x1], 1 }

</bundles_post_ra>
